<compile_context>
chip_gen: v7x
topology: tpu7x:2x2x1
jax: 0.10.0
libtpu: 0.0.40
codegen_flags: <defaults>
</compile_context>

<pallas_src>
import functools

import jax
import jax.numpy as jnp
from jax.experimental import pallas as pl
from jax.experimental.pallas import tpu as pltpu


def _round_up(x, m):
    return (x + m - 1) // m * m


def _periodic_conv_kernel(x_ref, w_ref, b_ref, col_ref, o_ref, pad_ref, patch_ref,
                          *, K, P, W, HW, C_in, S):
    # x_ref:     (1, C_in, HW)      f32  one image, spatially flattened (row-major)
    # w_ref:     (C_out, K*K*C_in)  bf16 weights, (kh, kw, cin) contraction order
    # b_ref:     (C_out, 1)         f32
    # col_ref:   (1, HW)            i32  w-coordinate of every flattened position
    # o_ref:     (1, C_out, HW)     f32
    # pad_ref:   (C_in, HW + 2*S)   f32  zero-bordered flattened image (scratch)
    # patch_ref: (K*K*C_in, HW)     f32  im2col patch matrix (scratch)

    # ---- fused padding: zero borders + image copy, all inside VMEM ----------
    border = jnp.zeros((C_in, S), dtype=pad_ref.dtype)
    pad_ref[:, :S] = border
    pad_ref[:, S + HW:S + HW + S] = border
    pad_ref[:, S:S + HW] = x_ref[0]            # S is 128-aligned -> clean store

    col = col_ref[...]                         # (1, HW); broadcasts over channels

    # ---- im2col: one (C_in, HW) slab per tap --------------------------------
    # For output (h, w) and tap (kh, kw) the source element is
    #   padded[h + kh - P, (w + kw - P) mod W]
    # which, on the flattened axis, is a constant-offset window of pad_ref plus
    # (for kw != P) a per-column select handling the circular W wrap; rows that
    # fall outside [0, H) land in the zero border (the zero H padding).
    for kh in range(K):                        # K is small & static -> unrolled
        for kw in range(K):
            dc = kw - P                        # column shift of this tap
            base = S + (kh - P) * W + dc       # offset of the non-wrapping window
            main = pad_ref[:, base:base + HW]
            if dc == 0:
                tap = main
            elif dc > 0:                       # last dc columns wrap to col 0..dc-1
                wrap = pad_ref[:, base - W:base - W + HW]
                tap = jnp.where(col >= W - dc, wrap, main)
            else:                              # first -dc columns wrap to col W+dc..
                wrap = pad_ref[:, base + W:base + W + HW]
                tap = jnp.where(col < -dc, wrap, main)
            t = kh * K + kw
            patch_ref[t * C_in:(t + 1) * C_in, :] = tap

    # ---- single lane-dense MXU contraction, f32 accumulation ----------------
    acc = jax.lax.dot_general(
        w_ref[...], patch_ref[...].astype(jnp.bfloat16),
        dimension_numbers=(((1,), (0,)), ((), ())),
        preferred_element_type=jnp.float32,
    )                                          # (C_out, HW), last dim % 128 == 0
    acc = acc + b_ref[...]                     # one lane-broadcast bias add
    o_ref[0] = acc.astype(o_ref.dtype)


def periodic_conv2d(x, weight, bias, *, kernel_size, stride=1, padding=0):
    """PeriodicConv2D forward.

    x:      (N, Cin, H, W)     float32 (NCHW, PyTorch convention)
    weight: (Cout, Cin, K, K)  float32 (nn.Conv2d layout)
    bias:   (Cout,)            float32
    returns (N, Cout, H, W)    float32
    """
    N, C_in, H, W = x.shape
    C_out = weight.shape[0]
    K = kernel_size
    P = padding

    # "Same"-style periodic conv: circular W pad + zero H pad of width (K-1)/2.
    # TODO(synk): general stride / padding != (K-1)//2 needs a non-unit row-stride
    # window mapping (strided in-kernel reads); not implemented in this path.
    assert stride == 1
    assert 2 * P == K - 1

    HW = H * W
    KKC = K * K * C_in
    # Slack so every shifted length-HW window stays inside the scratch row;
    # rounded up to a lane tile so the image copy is 128-lane aligned.
    S = _round_up((P + 1) * W, 128)

    # Wrapper-side work is layout plumbing only (free reshapes + tiny constants).
    x_flat = x.reshape(N, C_in, HW)
    w2 = jnp.transpose(weight, (0, 2, 3, 1)).reshape(C_out, KKC)   # (kh, kw, cin)
    w2 = w2.astype(jnp.bfloat16)                                   # MXU-native
    b2 = bias.reshape(C_out, 1).astype(jnp.float32)
    col_ids = jnp.tile(jnp.arange(W, dtype=jnp.int32), H).reshape(1, HW)

    kernel = functools.partial(
        _periodic_conv_kernel, K=K, P=P, W=W, HW=HW, C_in=C_in, S=S)

    out_flat = pl.pallas_call(
        kernel,
        out_shape=jax.ShapeDtypeStruct((N, C_out, HW), x.dtype),
        grid_spec=pltpu.PrefetchScalarGridSpec(
            num_scalar_prefetch=0,
            # One image per grid step; batch axis is parallel (feeds both TCs on
            # v7x).  TODO(synk): for large H*W tile the grid over output rows
            # with a K-1 halo (and set vmem_limit_bytes for v7x's 64 MiB VMEM);
            # for large N pack several images per step to amortize the ~0.35 us
            # per-step pipeline overhead.
            grid=(N,),
            in_specs=[
                pl.BlockSpec((1, C_in, HW), lambda n: (n, 0, 0)),
                pl.BlockSpec((C_out, KKC), lambda n: (0, 0)),
                pl.BlockSpec((C_out, 1), lambda n: (0, 0)),
                pl.BlockSpec((1, HW), lambda n: (0, 0)),
            ],
            out_specs=pl.BlockSpec((1, C_out, HW), lambda n: (n, 0, 0)),
            scratch_shapes=[
                pltpu.VMEM((C_in, HW + 2 * S), jnp.float32),   # padded image row
                pltpu.VMEM((KKC, HW), jnp.float32),            # im2col patches
            ],
        ),
        compiler_params=pltpu.CompilerParams(
            dimension_semantics=("parallel",),
        ),
    )(x_flat, w2, b2, col_ids)

    # Output was produced NCHW-flattened; this reshape is free.
    return out_flat.reshape(N, C_out, H, W)


if __name__ == "__main__":
    # Small shapes consistent with the module: N=2, Cin=4, H=W=16,
    # Cout=8, kernel_size=3, stride=1, padding=1 -> output (2, 8, 16, 16).
    N, C_in, H, W = 2, 4, 16, 16
    C_out, K, PAD = 8, 3, 1

    key = jax.random.PRNGKey(0)
    kx, kw, kb = jax.random.split(key, 3)
    x = jax.random.normal(kx, (N, C_in, H, W), dtype=jnp.float32)
    weight = jax.random.normal(kw, (C_out, C_in, K, K), dtype=jnp.float32) * 0.1
    bias = jax.random.normal(kb, (C_out,), dtype=jnp.float32) * 0.1

    out = periodic_conv2d(x, weight, bias, kernel_size=K, stride=1, padding=PAD)
    out = jax.block_until_ready(out)

    # Reference: explicit periodic pad + XLA valid conv in full f32.
    x_pad = jnp.concatenate([x[:, :, :, -PAD:], x, x[:, :, :, :PAD]], axis=-1)
    x_pad = jnp.pad(x_pad, ((0, 0), (0, 0), (PAD, PAD), (0, 0)))
    ref = jax.lax.conv_general_dilated(
        x_pad, weight, window_strides=(1, 1), padding="VALID",
        dimension_numbers=("NCHW", "OIHW", "NCHW"),
        precision=jax.lax.Precision.HIGHEST,
    ) + bias.reshape(1, -1, 1, 1)

    assert out.shape == (N, C_out, H, W)
    max_err = float(jnp.max(jnp.abs(out - ref)))
    # bf16 MXU operands with f32 accumulation -> relaxed tolerance.
    assert jnp.allclose(out, ref, atol=5e-2, rtol=5e-2), max_err

    print("KERNEL_OK")
</pallas_src>

<mosaic_0001>
module attributes {stable_mosaic.version = 11 : i64} {
  func.func @_periodic_conv_kernel(%arg0: i32, %arg1: memref<1x4x256xf32, #tpu.memory_space<vmem>>, %arg2: memref<8x36xbf16, #tpu.memory_space<vmem>>, %arg3: memref<8x1xf32, #tpu.memory_space<vmem>>, %arg4: memref<1x256xi32, #tpu.memory_space<vmem>>, %arg5: memref<1x8x256xf32, #tpu.memory_space<vmem>>, %arg6: memref<4x512xf32, #tpu.memory_space<vmem>>, %arg7: memref<36x256xf32, #tpu.memory_space<vmem>>) attributes {dimension_semantics = [#tpu.dimension_semantics<parallel>], iteration_bounds = array<i64: 2>, scalar_prefetch = 0 : i64, scratch_operands = 2 : i64, tpu.core_type = #tpu.core_type<tc>, window_params = [{transform_indices = @transform_0, window_bounds = array<i64: 1, 4, 256>}, {pipeline_mode = #tpu.pipeline_mode<synchronous>, transform_indices = @transform_1, window_bounds = array<i64: 8, 36>}, {pipeline_mode = #tpu.pipeline_mode<synchronous>, transform_indices = @transform_2, window_bounds = array<i64: 8, 1>}, {pipeline_mode = #tpu.pipeline_mode<synchronous>, transform_indices = @transform_3, window_bounds = array<i64: 1, 256>}, {transform_indices = @transform_4, window_bounds = array<i64: 1, 8, 256>}]} {
    %cst = arith.constant 0.000000e+00 : f32
    %0 = vector.broadcast %cst : f32 to vector<4x128xf32>
    %c0 = arith.constant 0 : index
    %c0_0 = arith.constant 0 : index
    %1 = vector.load %arg6[%c0, %c0_0] : memref<4x512xf32, #tpu.memory_space<vmem>>, vector<4x128xf32>
    tpu.vector_store %arg6[%c0, %c0_0], %0 {strides = array<i32>} : memref<4x512xf32, #tpu.memory_space<vmem>>, vector<4x128xf32>,
    %c0_1 = arith.constant 0 : index
    %c384 = arith.constant 384 : index
    %2 = vector.load %arg6[%c0_1, %c384] : memref<4x512xf32, #tpu.memory_space<vmem>>, vector<4x128xf32>
    tpu.vector_store %arg6[%c0_1, %c384], %0 {strides = array<i32>} : memref<4x512xf32, #tpu.memory_space<vmem>>, vector<4x128xf32>,
    %c0_2 = arith.constant 0 : index
    %c0_3 = arith.constant 0 : index
    %c0_4 = arith.constant 0 : index
    %3 = vector.load %arg1[%c0_2, %c0_3, %c0_4] : memref<1x4x256xf32, #tpu.memory_space<vmem>>, vector<1x4x256xf32>
    %4 = vector.shape_cast %3 : vector<1x4x256xf32> to vector<4x256xf32>
    %c0_5 = arith.constant 0 : index
    %c128 = arith.constant 128 : index
    %5 = vector.load %arg6[%c0_5, %c128] : memref<4x512xf32, #tpu.memory_space<vmem>>, vector<4x256xf32>
    tpu.vector_store %arg6[%c0_5, %c128], %4 {strides = array<i32>} : memref<4x512xf32, #tpu.memory_space<vmem>>, vector<4x256xf32>,
    %c0_6 = arith.constant 0 : index
    %c0_7 = arith.constant 0 : index
    %6 = vector.load %arg4[%c0_6, %c0_7] : memref<1x256xi32, #tpu.memory_space<vmem>>, vector<1x256xi32>
    %c0_8 = arith.constant 0 : index
    %c111 = arith.constant 111 : index
    %7 = vector.load %arg6[%c0_8, %c111] : memref<4x512xf32, #tpu.memory_space<vmem>>, vector<4x256xf32>
    %c0_9 = arith.constant 0 : index
    %c127 = arith.constant 127 : index
    %8 = vector.load %arg6[%c0_9, %c127] : memref<4x512xf32, #tpu.memory_space<vmem>>, vector<4x256xf32>
    %c1_i32 = arith.constant 1 : i32
    %9 = vector.broadcast %c1_i32 : i32 to vector<1x256xi32>
    %10 = arith.cmpi slt, %6, %9 : vector<1x256xi32>
    %11 = vector.shape_cast %10 : vector<1x256xi1> to vector<1x256xi1>
    %12 = vector.broadcast %11 : vector<1x256xi1> to vector<4x256xi1>
    %13 = arith.select %12, %8, %7 : vector<4x256xi1>, vector<4x256xf32>
    %c0_10 = arith.constant 0 : index
    %c0_11 = arith.constant 0 : index
    %14 = vector.load %arg7[%c0_10, %c0_11] : memref<36x256xf32, #tpu.memory_space<vmem>>, vector<4x256xf32>
    tpu.vector_store %arg7[%c0_10, %c0_11], %13 {strides = array<i32>} : memref<36x256xf32, #tpu.memory_space<vmem>>, vector<4x256xf32>,
    %c0_12 = arith.constant 0 : index
    %c112 = arith.constant 112 : index
    %15 = vector.load %arg6[%c0_12, %c112] : memref<4x512xf32, #tpu.memory_space<vmem>>, vector<4x256xf32>
    %c4 = arith.constant 4 : index
    %c0_13 = arith.constant 0 : index
    %16 = vector.load %arg7[%c4, %c0_13] : memref<36x256xf32, #tpu.memory_space<vmem>>, vector<4x256xf32>
    tpu.vector_store %arg7[%c4, %c0_13], %15 {strides = array<i32>} : memref<36x256xf32, #tpu.memory_space<vmem>>, vector<4x256xf32>,
    %c0_14 = arith.constant 0 : index
    %c113 = arith.constant 113 : index
    %17 = vector.load %arg6[%c0_14, %c113] : memref<4x512xf32, #tpu.memory_space<vmem>>, vector<4x256xf32>
    %c0_15 = arith.constant 0 : index
    %c97 = arith.constant 97 : index
    %18 = vector.load %arg6[%c0_15, %c97] : memref<4x512xf32, #tpu.memory_space<vmem>>, vector<4x256xf32>
    %c15_i32 = arith.constant 15 : i32
    %19 = vector.broadcast %c15_i32 : i32 to vector<1x256xi32>
    %20 = arith.cmpi sge, %6, %19 : vector<1x256xi32>
    %21 = vector.shape_cast %20 : vector<1x256xi1> to vector<1x256xi1>
    %22 = vector.broadcast %21 : vector<1x256xi1> to vector<4x256xi1>
    %23 = arith.select %22, %18, %17 : vector<4x256xi1>, vector<4x256xf32>
    %c8 = arith.constant 8 : index
    %c0_16 = arith.constant 0 : index
    %24 = vector.load %arg7[%c8, %c0_16] : memref<36x256xf32, #tpu.memory_space<vmem>>, vector<4x256xf32>
    tpu.vector_store %arg7[%c8, %c0_16], %23 {strides = array<i32>} : memref<36x256xf32, #tpu.memory_space<vmem>>, vector<4x256xf32>,
    %c0_17 = arith.constant 0 : index
    %c127_18 = arith.constant 127 : index
    %25 = vector.load %arg6[%c0_17, %c127_18] : memref<4x512xf32, #tpu.memory_space<vmem>>, vector<4x256xf32>
    %c0_19 = arith.constant 0 : index
    %c143 = arith.constant 143 : index
    %26 = vector.load %arg6[%c0_19, %c143] : memref<4x512xf32, #tpu.memory_space<vmem>>, vector<4x256xf32>
    %c1_i32_20 = arith.constant 1 : i32
    %27 = vector.broadcast %c1_i32_20 : i32 to vector<1x256xi32>
    %28 = arith.cmpi slt, %6, %27 : vector<1x256xi32>
    %29 = vector.shape_cast %28 : vector<1x256xi1> to vector<1x256xi1>
    %30 = vector.broadcast %29 : vector<1x256xi1> to vector<4x256xi1>
    %31 = arith.select %30, %26, %25 : vector<4x256xi1>, vector<4x256xf32>
    %c12 = arith.constant 12 : index
    %c0_21 = arith.constant 0 : index
    %32 = vector.load %arg7[%c12, %c0_21] : memref<36x256xf32, #tpu.memory_space<vmem>>, vector<4x256xf32>
    tpu.vector_store %arg7[%c12, %c0_21], %31 {strides = array<i32>} : memref<36x256xf32, #tpu.memory_space<vmem>>, vector<4x256xf32>,
    %c0_22 = arith.constant 0 : index
    %c128_23 = arith.constant 128 : index
    %33 = vector.load %arg6[%c0_22, %c128_23] : memref<4x512xf32, #tpu.memory_space<vmem>>, vector<4x256xf32>
    %c16 = arith.constant 16 : index
    %c0_24 = arith.constant 0 : index
    %34 = vector.load %arg7[%c16, %c0_24] : memref<36x256xf32, #tpu.memory_space<vmem>>, vector<4x256xf32>
    tpu.vector_store %arg7[%c16, %c0_24], %33 {strides = array<i32>} : memref<36x256xf32, #tpu.memory_space<vmem>>, vector<4x256xf32>,
    %c0_25 = arith.constant 0 : index
    %c129 = arith.constant 129 : index
    %35 = vector.load %arg6[%c0_25, %c129] : memref<4x512xf32, #tpu.memory_space<vmem>>, vector<4x256xf32>
    %c0_26 = arith.constant 0 : index
    %c113_27 = arith.constant 113 : index
    %36 = vector.load %arg6[%c0_26, %c113_27] : memref<4x512xf32, #tpu.memory_space<vmem>>, vector<4x256xf32>
    %c15_i32_28 = arith.constant 15 : i32
    %37 = vector.broadcast %c15_i32_28 : i32 to vector<1x256xi32>
    %38 = arith.cmpi sge, %6, %37 : vector<1x256xi32>
    %39 = vector.shape_cast %38 : vector<1x256xi1> to vector<1x256xi1>
    %40 = vector.broadcast %39 : vector<1x256xi1> to vector<4x256xi1>
    %41 = arith.select %40, %36, %35 : vector<4x256xi1>, vector<4x256xf32>
    %c20 = arith.constant 20 : index
    %c0_29 = arith.constant 0 : index
    %42 = vector.load %arg7[%c20, %c0_29] : memref<36x256xf32, #tpu.memory_space<vmem>>, vector<4x256xf32>
    tpu.vector_store %arg7[%c20, %c0_29], %41 {strides = array<i32>} : memref<36x256xf32, #tpu.memory_space<vmem>>, vector<4x256xf32>,
    %c0_30 = arith.constant 0 : index
    %c143_31 = arith.constant 143 : index
    %43 = vector.load %arg6[%c0_30, %c143_31] : memref<4x512xf32, #tpu.memory_space<vmem>>, vector<4x256xf32>
    %c0_32 = arith.constant 0 : index
    %c159 = arith.constant 159 : index
    %44 = vector.load %arg6[%c0_32, %c159] : memref<4x512xf32, #tpu.memory_space<vmem>>, vector<4x256xf32>
    %c1_i32_33 = arith.constant 1 : i32
    %45 = vector.broadcast %c1_i32_33 : i32 to vector<1x256xi32>
    %46 = arith.cmpi slt, %6, %45 : vector<1x256xi32>
    %47 = vector.shape_cast %46 : vector<1x256xi1> to vector<1x256xi1>
    %48 = vector.broadcast %47 : vector<1x256xi1> to vector<4x256xi1>
    %49 = arith.select %48, %44, %43 : vector<4x256xi1>, vector<4x256xf32>
    %c24 = arith.constant 24 : index
    %c0_34 = arith.constant 0 : index
    %50 = vector.load %arg7[%c24, %c0_34] : memref<36x256xf32, #tpu.memory_space<vmem>>, vector<4x256xf32>
    tpu.vector_store %arg7[%c24, %c0_34], %49 {strides = array<i32>} : memref<36x256xf32, #tpu.memory_space<vmem>>, vector<4x256xf32>,
    %c0_35 = arith.constant 0 : index
    %c144 = arith.constant 144 : index
    %51 = vector.load %arg6[%c0_35, %c144] : memref<4x512xf32, #tpu.memory_space<vmem>>, vector<4x256xf32>
    %c28 = arith.constant 28 : index
    %c0_36 = arith.constant 0 : index
    %52 = vector.load %arg7[%c28, %c0_36] : memref<36x256xf32, #tpu.memory_space<vmem>>, vector<4x256xf32>
    tpu.vector_store %arg7[%c28, %c0_36], %51 {strides = array<i32>} : memref<36x256xf32, #tpu.memory_space<vmem>>, vector<4x256xf32>,
    %c0_37 = arith.constant 0 : index
    %c145 = arith.constant 145 : index
    %53 = vector.load %arg6[%c0_37, %c145] : memref<4x512xf32, #tpu.memory_space<vmem>>, vector<4x256xf32>
    %c0_38 = arith.constant 0 : index
    %c129_39 = arith.constant 129 : index
    %54 = vector.load %arg6[%c0_38, %c129_39] : memref<4x512xf32, #tpu.memory_space<vmem>>, vector<4x256xf32>
    %c15_i32_40 = arith.constant 15 : i32
    %55 = vector.broadcast %c15_i32_40 : i32 to vector<1x256xi32>
    %56 = arith.cmpi sge, %6, %55 : vector<1x256xi32>
    %57 = vector.shape_cast %56 : vector<1x256xi1> to vector<1x256xi1>
    %58 = vector.broadcast %57 : vector<1x256xi1> to vector<4x256xi1>
    %59 = arith.select %58, %54, %53 : vector<4x256xi1>, vector<4x256xf32>
    %c32 = arith.constant 32 : index
    %c0_41 = arith.constant 0 : index
    %60 = vector.load %arg7[%c32, %c0_41] : memref<36x256xf32, #tpu.memory_space<vmem>>, vector<4x256xf32>
    tpu.vector_store %arg7[%c32, %c0_41], %59 {strides = array<i32>} : memref<36x256xf32, #tpu.memory_space<vmem>>, vector<4x256xf32>,
    %c0_42 = arith.constant 0 : index
    %c0_43 = arith.constant 0 : index
    %61 = vector.load %arg2[%c0_42, %c0_43] : memref<8x36xbf16, #tpu.memory_space<vmem>>, vector<8x36xbf16>
    %c0_44 = arith.constant 0 : index
    %c0_45 = arith.constant 0 : index
    %62 = vector.load %arg7[%c0_44, %c0_45] : memref<36x256xf32, #tpu.memory_space<vmem>>, vector<36x256xf32>
    %63 = arith.truncf %62 : vector<36x256xf32> to vector<36x256xbf16>
    %cst_46 = arith.constant dense<0.000000e+00> : vector<8x256xf32>
    %64 = tpu.matmul %61, %63, %cst_46 {dimension_numbers = #tpu.dot_dimension_numbers<[1], [0], [0], [1], [0, 0, 1, 1], [], []>} : vector<8x36xbf16>, vector<36x256xbf16>, vector<8x256xf32> -> vector<8x256xf32>
    %c0_47 = arith.constant 0 : index
    %c0_48 = arith.constant 0 : index
    %65 = vector.load %arg3[%c0_47, %c0_48] : memref<8x1xf32, #tpu.memory_space<vmem>>, vector<8x1xf32>
    %66 = vector.broadcast %65 : vector<8x1xf32> to vector<8x256xf32>
    %67 = arith.addf %64, %66 : vector<8x256xf32>
    %c0_49 = arith.constant 0 : index
    %c0_50 = arith.constant 0 : index
    %c0_51 = arith.constant 0 : index
    %68 = vector.load %arg5[%c0_49, %c0_50, %c0_51] : memref<1x8x256xf32, #tpu.memory_space<vmem>>, vector<1x8x256xf32>
    %69 = vector.shape_cast %68 : vector<1x8x256xf32> to vector<8x256xf32>
    %70 = vector.shape_cast %67 : vector<8x256xf32> to vector<1x8x256xf32>
    tpu.vector_store %arg5[%c0_49, %c0_50, %c0_51], %70 {strides = array<i32>} : memref<1x8x256xf32, #tpu.memory_space<vmem>>, vector<1x8x256xf32>,
    return
  }
  func.func @transform_0(%arg0: i32) -> (i32, i32, i32) {
    %c0_i32 = arith.constant 0 : i32
    %c0_i32_0 = arith.constant 0 : i32
    %c0_i32_1 = arith.constant 0 : i32
    return %arg0, %c0_i32, %c0_i32_0 : i32, i32, i32
  }
  func.func @transform_1(%arg0: i32) -> (i32, i32) {
    %c0_i32 = arith.constant 0 : i32
    %c0_i32_0 = arith.constant 0 : i32
    %c0_i32_1 = arith.constant 0 : i32
    return %c0_i32, %c0_i32_0 : i32, i32
  }
  func.func @transform_2(%arg0: i32) -> (i32, i32) {
    %c0_i32 = arith.constant 0 : i32
    %c0_i32_0 = arith.constant 0 : i32
    %c0_i32_1 = arith.constant 0 : i32
    return %c0_i32, %c0_i32_0 : i32, i32
  }
  func.func @transform_3(%arg0: i32) -> (i32, i32) {
    %c0_i32 = arith.constant 0 : i32
    %c0_i32_0 = arith.constant 0 : i32
    %c0_i32_1 = arith.constant 0 : i32
    return %c0_i32, %c0_i32_0 : i32, i32
  }
  func.func @transform_4(%arg0: i32) -> (i32, i32, i32) {
    %c0_i32 = arith.constant 0 : i32
    %c0_i32_0 = arith.constant 0 : i32
    %c0_i32_1 = arith.constant 0 : i32
    return %arg0, %c0_i32, %c0_i32_0 : i32, i32, i32
  }
}

</mosaic_0001>

<bundles_post_ra>
// kernel: tpu_custom_call.1
= control target key start
LH: loop header
LB: loop body
LE: loop exit
PB: predicated region body
PF: predicated region fallthrough
CT: control target
= control target key end

     0   :  { %9 = vsyncpa [#allocation5], 0  ;;  %s1135_s0 = inlined_call_operand.hbm [shape: f32[2,4,256], index: 0, kind: input, shape index: {}]   ;;  %s1136_s1 = inlined_call_operand.vmem [shape: bf16[8,36], index: 1, kind: input, shape index: {}]   ;;  %s1137_s2 = inlined_call_operand.vmem [shape: f32[8,1], index: 2, kind: input, shape index: {}]   ;;  %s1138_s3 = inlined_call_operand.vmem [shape: s32[1,256], index: 3, kind: input, shape index: {}]   ;;  %s1139_s4 = inlined_call_operand.hbm [shape: f32[2,8,256], index: 4, kind: output, shape index: {}]  }
   0x1   :  { %11 = vsyncpa [#allocation5 + $0x1], 0 }
   0x2   :  { %12 = vsyncpa [#allocation6], 0 }
   0x3   :  { %14 = vsyncpa [#allocation6 + $0x1], 0  ;;  %s874_s15 = smov 0   ;;  %s876_s16 = smov 0  }
   0x4   :  { %s878_s17 = smov 0   ;;  %s880_s18 = smov 0  }
   0x5 LB: > { %s895_s19 = sadd.s32 4294967295, %s833_s18   ;;  %s654_s20 = sadd.s32 4294967294, %s833_s18   ;;  %s833_s18 = sphi %s880_s18, %s1154_s18   ;;  %s829_s17 = sphi %s878_s17, %s1153_s17   ;;  %s825_s16 = sphi %s876_s16, %s1152_s16   ;;  %s821_s15 = sphi %s874_s15, %s1151_s15  }
   0x6   : > { %s899_s21 = sadd.s32 1, %s833_s18   ;;  %s27_s22 = sadd.s32 1, %s829_s17 }
   0x7   : > { %s24_s23 = ssub.s32 %s833_s18, %s899_s21  ;;  %p34_p0 = scmp.ne.s32.totalorder %s829_s17, %s825_s16 }
   0x8   : > { %p25_p1 = scmp.eq.s32.totalorder %s24_s23, 0  ;;  %p35_p2 = scmp.eq.s32.totalorder %s833_s18, 0 }
   0x9   : > { %p40_p3 = scmp.ne.s32.totalorder %s825_s16, %s821_s15  ;;  %p41_p4 = scmp.eq.s32.totalorder %s895_s19, 0 }
   0xa   : > { %s911_s24 = scalar_select %p25_p1, %s829_s17, %s27_s22  }
   0xb   : > { %p913_p5 = por %p35_p2, %p34_p0  ;;  %p917_p6 = por %p41_p4, %p40_p3 }
   0xc   : > { %p127_p7 = scmp.eq.s32.totalorder %s895_s19, 1  ;;  %p133_p8 = scmp.eq.s32.totalorder %s654_s20, 1 }
   0xd   : > { %p684_p10 = scmp.lt.s32.totalorder %s833_s18, 2  ;;  %s162_s29 = sand.u32 1, %s829_s17  }
   0xe   : > { %p924_p11 = por %p127_p7, %p34_p0  ;;  %p928_p12 = por %p133_p8, %p40_p3 }
   0xf   : > { %s670_s30 = sshll.u32 %s833_s18, 7  ;;  %s657_s5 = sshll.u32 %s162_s29, 3 }
  0x10   : > { %s1143_s27 = scalar_select %p924_p11, 1, 0 }
  0x11   : > { %s1144_s28 = scalar_select %p928_p12, 1, 0 }
  0x12   : > { %s937_s8 = scalar_lea.hbm %s1135_s0, %s670_s30  ;;  %s166_s9 = scalar_lea.vmem [#allocation4], %s657_s5 }
  0x13   : > { %s174_s10 = sshll.u32 %s166_s9, 4  ;;  %p941_p13 = pnand %p684_p10, %p913_p5  ;;  %s945_s10 = int_to_ptr.vmem [resolvable:$true] %s174_s10 }
  0x14   : > { %s163_s12 = scalar_lea.sflag [#allocation5], %s162_s29  ;;  %s737_s13 = scalar_lea.hbm %s937_s8, 128 }
  0x15   : > { %p738_p2 = scmp.ne.s32.totalorder %s937_s8, %s737_s13  ;;  %p739_p3 = pneg %p941_p13 }
  0x16   : > { %s742_s22 = scalar_lea.hbm %s1135_s0, 256  ;;  %p743_p5 = scmp.lt.u32.totalorder %s937_s8, %s1135_s0 }
  0x17   : > { %p740_p4 = pnand %p739_p3, %p738_p2  ;;  %p744_p8 = scmp.lt.u32.totalorder %s742_s22, %s737_s13 }
  0x18   : > { %p746_p9 = scmp.lt.u32.totalorder %s737_s13, %s937_s8 }
  0x19   : > { %p741_p7 = pneg %p740_p4  ;;  %p745_p10 = por %p744_p8, %p743_p5 }
  0x1b   : > { %p747_p0 = por %p746_p9, %p745_p10 }
  0x1d   : > { %p748_p1 = pnand %p747_p0, %p741_p7 }
  0x1f   : > { %751 = shalt.err (!%p748_p1)
}
  0x20   : > { %s752_s29 = scalar_lea.vmem %s945_s10, 128  ;;  %s835_s30 = smov [#allocation4]  }
  0x21   : > { %p753_p2 = scmp.ne.s32.totalorder %s945_s10, %s752_s29  ;;  %s757_s5 = sshll.u32 %s835_s30, 4  ;;  %s758_s5 = int_to_ptr.vmem [resolvable:$false] %s757_s5 }
  0x22   : > { %s759_s6 = scalar_lea.vmem %s758_s5, 256  ;;  %p760_p11 = scmp.lt.s32.totalorder %s945_s10, %s758_s5 }
  0x23   : > { %p755_p4 = pnand %p753_p2, %p739_p3  ;;  %p761_p5 = scmp.lt.s32.totalorder %s759_s6, %s752_s29 }
  0x25   : > { %p756_p12 = pneg %p755_p4  ;;  %p762_p8 = por %p761_p5, %p760_p11 }
  0x27   : > { %p763_p9 = pnand %p762_p8, %p756_p12 }
  0x29   : > { %766 = shalt.err (!%p763_p9)
}
  0x2a   : > { %679 = dma.hbm_to_vmem [thread:$0]  (!%p941_p13), %s937_s8, 128, %s945_s10, %s163_s12  }
  0x2b   : > { %p1146_p0 = scmp.lt.s32.totalorder %s833_s18, 3  ;;  %p1147_p1 = scmp.ge.s32.totalorder %s833_s18, 1 }
  0x2d   : > { %p180_p3 = pnand %p1147_p1, %p1146_p0 }
  0x2e   : > { %s979_s7 = sand.u32 (!%p180_p3), 1, %s825_s16  }
  0x2f   : > { %183 = sbr.rel (%p180_p3) target bundleno = 505 (0x1f9), region = 36  ;;  %s661_s9 = sshll.u32 (!%p180_p3), %s979_s7, 3 }
  0x30   : > { %s186_s13 = scalar_lea.sflag (!%p180_p3), [#allocation5], %s979_s7  ;;  %s189_s14 = scalar_lea.vmem (!%p180_p3), [#allocation4], %s661_s9 }
  0x36   : > { %812 = dma.done.wait (%p917_p6), %s186_s13, 128  }
  0x37   : > { %814 = vsyncadd (%p917_p6), %s186_s13, 4294967168  ;;  %v836_v0 = vmov 0.0   ;;  %v987_v1 = vld [vmem:[%s189_s14] sm:$0xff]  ;;  %s837_s8 = smov 113   ;;  %v838_v4 = vmov 0   ;;  %s839_s26 = smov 1   ;;  %v224_v20 = vlaneseq }
  0x38   : > { %216 = vst [vmem:[#allocation2 + $0xc] sm:$0xf] %v836_v0  ;;  %215 = vst [vmem:[#allocation2] sm:$0xf] %v836_v0  ;;  %v992_v3 = vcombine.high %v987_v1, %v987_v1  ;;  %558 = vmatprep.mubr.bf16.mxu0 %v838_v4  ;;  %730 = vset.pattern.permute.xlu0 %v838_v4  ;;  %s840_s10 = smov 17   ;;  %s841_s11 = smov 31   ;;  %v447_v16 = vcombine.low %v987_v1, %v987_v1 }
  0x39   : > { %218 = vst [vmem:[#allocation2 + $0x4] sm:$0xff] %v987_v1  ;;  %370 = vst [vmem:[#allocation3 + $0x20] sm:$0xf] %v987_v1  ;;  %s842_s12 = smov 15   ;;  %s843_s20 = smov 16   ;;  %v509_v18 = vld [vmem:[%s1137_s2] sm:$0xff] }
  0x3a   : > { %371 = vst [vmem:[#allocation3 + $0x28] sm:$0xf] %v992_v3  ;;  %s844_s22 = smov 127   ;;  %s845_s23 = smov 97   ;;  %v219_v22 = vld [vmem:[%s1138_s3] sm:$0x3] }
  0x3b   : > { %s846_s25 = smov 112   ;;  %s847_s29 = smov 111   ;;  %v225_v23 = vshrl.u32 %v224_v20, 7  ;;  %vm222_vm0 = vcmp.lt.s32.totalorder %v219_v22, 1  ;;  %vm243_vm1 = vcmask 7168   ;;  %vm254_vm2 = vcmask 138240  }
  0x3c   : > { %v223_v28 = vsel %vm222_vm0, 1, %v838_v4  ;;  %vm284_vm4 = vcmp.ge.s32.totalorder %v219_v22, 15  ;;  %vm338_vm5 = vcmask 924672   ;;  %vm305_vm7 = vcmask 252928   ;;  %p1148_p11 = scmp.ne.s32.totalorder %s1143_s27, 0 }
  0x3d   : > { %v230_v26 = vsub.s32 1, %v225_v23  ;;  %v226_v31 = vsub.s32 0, %v225_v23  ;;  %v285_v41 = vsel %vm284_vm4, 1, %v838_v4  ;;  %vm316_vm8 = vcmask 121856  }
  0x3e   : > { %vm275_vm10 = vcmask 130048   ;;  %vm398_vm12 = vcmask 1039360   ;;  %vm424_vm13 = vcmask 793600   ;;  %vm455_vm14 = vcmask 916480  }
  0x3f   : > { %v328_v2 = vld [vmem:[#allocation2 + $0xc] sm:$0xf]  ;;  %v1026_v30 = vrot.slane %v223_v28, %v230_v26  ;;  %v1029_v34 = vrot.slane %v223_v28, %v226_v31  ;;  %v1045_v51 = vrot.slane %v285_v41, %v230_v26  ;;  %v1056_v0 = vrot.slane %v285_v41, %v226_v31 }
  0x40   : > { %336 = vrot.lane.b32.xlu0 %v328_v2, %s837_s8  ;;  %v326_v5 = vld [vmem:[#allocation2 + $0x8] sm:$0xf]  ;;  %v325_v6 = vld [vmem:[#allocation2] sm:$0xff]  ;;  %v373_v13 = vld [vmem:[#allocation2 + $0xc] sm:$0xf]  ;;  %vm483_vm15 = vcmask 908288  }
  0x41   : > { %350 = vrot.lane.b32.xlu1 %v326_v5, %s839_s26  ;;  %v345_v7 = vcombine.high %v325_v6, %v325_v6  ;;  %v221_v8 = vld [vmem:[#allocation2 + $0x8] sm:$0xf]  ;;  %v267_v11 = vcombine.low %v325_v6, %v325_v6  ;;  %v414_v14 = vld [vmem:[#allocation2 + $0xc] sm:$0xf]  ;;  %vm233_vm3 = vcmp.eq.s32.totalorder %v1026_v30, 1  ;;  %vm232_vm6 = vcmp.eq.s32.totalorder %v1029_v34, 1 }
  0x42   : > { %v283_v9 = vld [vmem:[#allocation2 + $0x8] sm:$0xf]  ;;  %v736_v15 = vld [vmem:[#allocation2 + $0xc] ss:$0 sps:$4 sm:$0xff]   ;;  %vm295_vm9 = vcmp.eq.s32.totalorder %v1045_v51, 1  ;;  %vm294_vm11 = vcmp.eq.s32.totalorder %v1056_v0, 1 }
  0x43   : > { %v734_v10 = vld [vmem:[#allocation2 + $0x8] ss:$0 sps:$4 sm:$0xff]   ;;  %v463_v17 = vld [vmem:[#allocation2 + $0xc] sm:$0xf]  ;;  %vm519_vm0 = vcmask 1041408  }
  0x44   : > { %332 = vrot.lane.b32.xlu0 %v987_v1, %s837_s8  ;;  %v375_v12 = vld [vmem:[#allocation2 + $0x8] sm:$0xf] }
  0x45   : > { %346 = vrot.lane.b32.xlu1 %v325_v6, %s839_s26 }
  0x48   : > { %334 = vrot.lane.b32.xlu0 %v992_v3, %s837_s8 }
  0x49   : > { %241 = vrot.lane.b32.xlu1 %v221_v8, %s839_s26 }
  0x4c   : > { %239 = vrot.lane.b32.xlu0 %v345_v7, %s839_s26 }
  0x4d   : > { %252 = vrot.lane.b32.xlu1 %v221_v8, %s840_s10 }
  0x50   : > { %250 = vrot.lane.b32.xlu0 %v345_v7, %s840_s10 }
  0x51   : > { %348 = vrot.lane.b32.xlu1 %v345_v7, %s839_s26 }
  0x54   : > { %301 = vrot.lane.b32.xlu0 %v345_v7, %s841_s11 }
  0x55   : > { %303 = vrot.lane.b32.xlu1 %v283_v9, %s841_s11 }
  0x58   : > { %312 = vrot.lane.b32.xlu0 %v345_v7, %s842_s12 }
  0x59   : > { %314 = vrot.lane.b32.xlu1 %v283_v9, %s842_s12 }
  0x5c   : > { %237 = vrot.lane.b32.xlu0 %v325_v6, %s839_s26  ;;  %s671_s26 = sshll.u32 %s895_s19, 8  ;;  %s570_s19 = scalar_lea.sflag [#allocation6], %s979_s7 }
  0x5d   : > { %248 = vrot.lane.b32.xlu1 %v325_v6, %s840_s10 }
  0x60   : > { %271 = vrot.lane.b32.xlu0 %v325_v6, %s843_s20 }
  0x61   : > { %273 = vrot.lane.b32.xlu1 %v734_v10, %s843_s20 }
  0x64   : > { %299 = vrot.lane.b32.xlu0 %v325_v6, %s841_s11 }
  0x65   : > { %310 = vrot.lane.b32.xlu1 %v325_v6, %s842_s12 }
  0x68   : > { %269 = vrot.lane.b32.xlu0 %v267_v11, %s843_s20 }
  0x69   : > { %381 = vrot.lane.b32.xlu1 %v345_v7, %s842_s12 }
  0x6c   : > { %383 = vrot.lane.b32.xlu0 %v375_v12, %s842_s12 }
  0x6d   : > { %394 = vrot.lane.b32.xlu1 %v992_v3, %s844_s22 }
  0x70   : > { %396 = vrot.lane.b32.xlu0 %v373_v13, %s844_s22 }
  0x71   : > { %379 = vrot.lane.b32.xlu1 %v325_v6, %s842_s12 }
  0x74   : > { %392 = vrot.lane.b32.xlu0 %v987_v1, %s844_s22 }
  0x75   : > { %420 = vrot.lane.b32.xlu1 %v992_v3, %s845_s23 }
  0x78   : > { %422 = vrot.lane.b32.xlu0 %v414_v14, %s845_s23 }
  0x79   : > { %431 = vrot.lane.b32.xlu1 %v992_v3, %s837_s8 }
  0x7c   : > { %433 = vrot.lane.b32.xlu0 %v414_v14, %s837_s8 }
  0x7d   : > { %418 = vrot.lane.b32.xlu1 %v987_v1, %s845_s23 }
  0x80   : > { %429 = vrot.lane.b32.xlu0 %v987_v1, %s837_s8  ;;  %s662_s8 = sshll.u32 %s979_s7, 4 }
  0x81   : > { %451 = vrot.lane.b32.xlu1 %v987_v1, %s846_s25  ;;  %s213_s10 = scalar_lea.vmem [#allocation7], %s662_s8 }
  0x82   : > { %s584_s11 = sshll.u32 %s213_s10, 4  ;;  %s1093_s11 = int_to_ptr.vmem [resolvable:$true] %s584_s11 }
  0x83   : > { %s767_s23 = scalar_lea.vmem %s1093_s11, 256 }
  0x84   : > { %453 = vrot.lane.b32.xlu0 %v736_v15, %s846_s25  ;;  %p768_p6 = scmp.ne.s32.totalorder %s1093_s11, %s767_s23 }
  0x85   : > { %449 = vrot.lane.b32.xlu1 %v447_v16, %s846_s25  ;;  %s848_s25 = smov [#allocation7]  }
  0x86   : > { %p769_p12 = pnand %p768_p6, %p1148_p11 }
  0x88   : > { %467 = vrot.lane.b32.xlu0 %v987_v1, %s844_s22  ;;  %p770_p13 = pneg %p769_p12 }
  0x89   : > { %469 = vrot.lane.b32.xlu1 %v992_v3, %s844_s22 }
  0x8c   : > { %471 = vrot.lane.b32.xlu0 %v463_v17, %s844_s22  ;;  %s1091_s22 = scalar_lea.hbm %s1139_s4, %s671_s26 }
  0x8d   : > { %477 = vrot.lane.b32.xlu1 %v987_v1, %s847_s29 }
  0x90   : > { %479 = vrot.lane.b32.xlu0 %v992_v3, %s847_s29 }
  0x91   : > { %481 = vrot.lane.b32.xlu1 %v463_v17, %s847_s29  ;;  %s771_s29 = sshll.u32 %s848_s25, 4  ;;  %s772_s29 = int_to_ptr.vmem [resolvable:$false] %s771_s29 }
  0x92   : > { %s773_s30 = scalar_lea.vmem %s772_s29, 512  ;;  %p774_p7 = scmp.lt.s32.totalorder %s1093_s11, %s772_s29 }
  0x93   : > { %p775_p10 = scmp.lt.s32.totalorder %s773_s30, %s767_s23 }
  0x94   : > { %512 = vperm.xlu0 %730, %v509_v18  }
  0x95   : > { %p776_p2 = por %p775_p10, %p774_p7 }
  0x97   : > { %p777_p4 = pnand %p776_p2, %p770_p13 }
  0xb2   : > { %v337_v19 = vpop.permute.xlu0 %336 }
  0xb3   : > { %v351_v24 = vpop.permute.xlu1 %350 }
  0xb6   : > { %v333_v21 = vpop.permute.xlu0 %332 }
  0xb7   : > { %v347_v27 = vpop.permute.xlu1 %346 }
  0xba   : > { %v335_v25 = vpop.permute.xlu0 %334 }
  0xbb   : > { %v242_v32 = vpop.permute.xlu1 %241  ;;  %v339_v42 = vsel %vm338_vm5, %v333_v21, %v335_v25  ;;  %v340_v43 = vsel %vm338_vm5, %v335_v25, %v337_v19 }
  0xbe   : > { %v240_v29 = vpop.permute.xlu0 %239 }
  0xbf   : > { %v253_v35 = vpop.permute.xlu1 %252  ;;  %v245_v36 = vsel %vm243_vm1, %v240_v29, %v242_v32 }
  0xc2   : > { %v251_v33 = vpop.permute.xlu0 %250 }
  0xc3   : > { %v256_v37 = vsel %vm254_vm2, %v251_v33, %v253_v35  ;;  %v349_v40 = vpop.permute.xlu1 %348 }
  0xc4   : > { %v260_v39 = vsel %vm233_vm3, %v245_v36, %v256_v37  ;;  %v352_v44 = vsel %vm243_vm1, %v347_v27, %v349_v40  ;;  %v353_v45 = vsel %vm243_vm1, %v349_v40, %v351_v24 }
  0xc5   : > { %262 = vst [vmem:[#allocation3 + $0x8] sm:$0xf] %v260_v39  ;;  %v356_v47 = vsel %vm232_vm6, %v339_v42, %v352_v44  ;;  %v357_v48 = vsel %vm233_vm3, %v340_v43, %v353_v45 }
  0xc6   : > { %v302_v38 = vpop.permute.xlu0 %301  ;;  %v360_v49 = vrot.slane %v356_v47, 4  ;;  %v361_v50 = vrot.slane %v357_v48, 4 }
  0xc7   : > { %v304_v52 = vpop.permute.xlu1 %303 }
  0xc8   : > { %364 = vst [vmem:[#allocation3 + $0x10] sm:$0xf0] %v360_v49  ;;  %365 = vst [vmem:[#allocation3 + $0x18] sm:$0xf0] %v361_v50  ;;  %v307_v55 = vsel %vm305_vm7, %v302_v38, %v304_v52 }
  0xca   : > { %v313_v46 = vpop.permute.xlu0 %312 }
  0xcb   : > { %v315_v54 = vpop.permute.xlu1 %314 }
  0xcc   : > { %v318_v56 = vsel %vm316_vm8, %v313_v46, %v315_v54 }
  0xcd   : > { %v322_v58 = vsel %vm295_vm9, %v307_v55, %v318_v56 }
  0xce   : > { %v238_v53 = vpop.permute.xlu0 %237  ;;  %324 = vst [vmem:[#allocation3 + $0x18] sm:$0xf] %v322_v58 }
  0xcf   : > { %v249_v59 = vpop.permute.xlu1 %248  ;;  %v244_v60 = vsel %vm243_vm1, %v238_v53, %v240_v29  ;;  %vm515_vm1 = vcmask 293888  }
  0xd0   : > { %v255_v61 = vsel %vm254_vm2, %v249_v59, %v251_v33 }
  0xd1   : > { %v259_v63 = vsel %vm232_vm6, %v244_v60, %v255_v61 }
  0xd2   : > { %v272_v57 = vpop.permute.xlu0 %271  ;;  %261 = vst [vmem:[#allocation3] sm:$0xf] %v259_v63 }
  0xd3   : > { %v274_v1 = vpop.permute.xlu1 %273 }
  0xd4   : > { %v277_v2 = vsel %vm275_vm10, %v272_v57, %v274_v1 }
  0xd5   : > { %281 = vst [vmem:[#allocation3 + $0x8] sm:$0xf0] %v277_v2  ;;  %v496_v12 = vld [vmem:[#allocation3 + $0x18] sm:$0xff] }
  0xd6   : > { %v300_v62 = vpop.permute.xlu0 %299 }
  0xd7   : > { %v311_v5 = vpop.permute.xlu1 %310  ;;  %v306_v6 = vsel %vm305_vm7, %v300_v62, %v302_v38 }
  0xd8   : > { %v317_v7 = vsel %vm316_vm8, %v311_v5, %v313_v46 }
  0xd9   : > { %v321_v9 = vsel %vm294_vm11, %v306_v6, %v317_v7  ;;  %v492_v6 = vld [vmem:[%s1136_s1] sm:$0xf] }
  0xda   : > { %v270_v3 = vpop.permute.xlu0 %269  ;;  %323 = vst [vmem:[#allocation3 + $0x10] sm:$0xf] %v321_v9 }
  0xdb   : > { %v276_v4 = vsel %vm275_vm10, %v270_v3, %v272_v57  ;;  %v382_v10 = vpop.permute.xlu1 %381 }
  0xdc   : > { %280 = vst [vmem:[#allocation3] sm:$0xf0] %v276_v4  ;;  %v494_v11 = vld [vmem:[#allocation3 + $0x8] sm:$0xff] }
  0xdd   : > { %v504_v14 = vpack.c.bf16 %v496_v12, %v494_v11 }
  0xde   : > { %v384_v8 = vpop.permute.xlu0 %383 }
  0xdf   : > { %v395_v15 = vpop.permute.xlu1 %394  ;;  %526 = vmatprep.subr.bf16.mxu0 %v504_v14  ;;  %v386_v16 = vsel %vm316_vm8, %v382_v10, %v384_v8 }
  0xe1   : > { %v495_v21 = vld [vmem:[#allocation3 + $0x10] sm:$0xff] }
  0xe2   : > { %v397_v13 = vpop.permute.xlu0 %396 }
  0xe3   : > { %v400_v17 = vsel %vm398_vm12, %v395_v15, %v397_v13  ;;  %v493_v20 = vld [vmem:[#allocation3] sm:$0xff]  ;;  %v380_v24 = vpop.permute.xlu1 %379 }
  0xe4   : > { %v404_v19 = vsel %vm295_vm9, %v386_v16, %v400_v17  ;;  %v503_v23 = vpack.c.bf16 %v495_v21, %v493_v20  ;;  %v385_v25 = vsel %vm316_vm8, %v380_v24, %v382_v10 }
  0xe5   : > { %v408_v22 = vrot.slane %v404_v19, 4 }
  0xe6   : > { %v393_v18 = vpop.permute.xlu0 %392  ;;  %527 = vmatpush1.bf16.msra.mxu0 %v503_v23 }
  0xe7   : > { %412 = vst [vmem:[#allocation3 + $0x28] sm:$0xf0] %v408_v22  ;;  %v399_v26 = vsel %vm398_vm12, %v393_v18, %v395_v15  ;;  %v421_v31 = vpop.permute.xlu1 %420 }
  0xe8   : > { %v403_v28 = vsel %vm294_vm11, %v385_v25, %v399_v26 }
  0xe9   : > { %v407_v29 = vrot.slane %v403_v28, 4 }
  0xea   : > { %v423_v27 = vpop.permute.xlu0 %422 }
  0xeb   : > { %411 = vst [vmem:[#allocation3 + $0x20] sm:$0xf0] %v407_v29  ;;  %v432_v33 = vpop.permute.xlu1 %431  ;;  %v426_v35 = vsel %vm424_vm13, %v421_v31, %v423_v27 }
  0xee   : > { %v434_v32 = vpop.permute.xlu0 %433  ;;  %v498_v50 = vld [vmem:[#allocation3 + $0x28] sm:$0xff] }
  0xef   : > { %v436_v36 = vsel %vm338_vm5, %v432_v33, %v434_v32  ;;  %v419_v39 = vpop.permute.xlu1 %418 }
  0xf0   : > { %v440_v38 = vsel %vm233_vm3, %v426_v35, %v436_v36  ;;  %v425_v40 = vsel %vm424_vm13, %v419_v39, %v421_v31 }
  0xf1   : > { %442 = vst [vmem:[#allocation3 + $0x38] sm:$0xf] %v440_v38 }
  0xf2   : > { %v430_v37 = vpop.permute.xlu0 %429  ;;  %v497_v57 = vld [vmem:[#allocation3 + $0x20] sm:$0xff] }
  0xf3   : > { %v435_v41 = vsel %vm338_vm5, %v430_v37, %v432_v33  ;;  %v452_v44 = vpop.permute.xlu1 %451 }
  0xf4   : > { %v439_v43 = vsel %vm232_vm6, %v425_v40, %v435_v41 }
  0xf5   : > { %441 = vst [vmem:[#allocation3 + $0x30] sm:$0xf] %v439_v43 }
  0xf6   : > { %v454_v42 = vpop.permute.xlu0 %453 }
  0xf7   : > { %v457_v45 = vsel %vm455_vm14, %v452_v44, %v454_v42  ;;  %v450_v47 = vpop.permute.xlu1 %449 }
  0xf8   : > { %461 = vst [vmem:[#allocation3 + $0x38] sm:$0xf0] %v457_v45  ;;  %v456_v48 = vsel %vm455_vm14, %v450_v47, %v452_v44 }
  0xf9   : > { %460 = vst [vmem:[#allocation3 + $0x30] sm:$0xf0] %v456_v48 }
  0xfa   : > { %v468_v46 = vpop.permute.xlu0 %467 }
  0xfb   : > { %v470_v30 = vpop.permute.xlu1 %469 }
  0xfc   : > { %v473_v34 = vsel %vm398_vm12, %v468_v46, %v470_v30 }
  0xfe   : > { %v472_v49 = vpop.permute.xlu0 %471 }
  0xff   : > { %v500_v52 = vld [vmem:[#allocation3 + $0x38] sm:$0xff]  ;;  %v478_v55 = vpop.permute.xlu1 %477  ;;  %v474_v62 = vsel %vm398_vm12, %v470_v30, %v472_v49 }
 0x100   : > { %v506_v53 = vpack.c.bf16 %v500_v52, %v498_v50  ;;  %v499_v58 = vld [vmem:[#allocation3 + $0x30] sm:$0xff] }
 0x101   : > { %v505_v60 = vpack.c.bf16 %v499_v58, %v497_v57 }
 0x102   : > { %v480_v54 = vpop.permute.xlu0 %479  ;;  %528 = vmatprep.subr.bf16.mxu0 %v506_v53 }
 0x103   : > { %v484_v56 = vsel %vm483_vm15, %v478_v55, %v480_v54  ;;  %v482_v61 = vpop.permute.xlu1 %481  ;;  %529 = vmatpush1.bf16.msra.mxu0 %v505_v60 }
 0x104   : > { %v488_v59 = vsel %vm294_vm11, %v473_v34, %v484_v56  ;;  %v485_v63 = vsel %vm483_vm15, %v480_v54, %v482_v61 }
 0x105   : > { %490 = vst [vmem:[#allocation3 + $0x40] sm:$0xf] %v488_v59  ;;  %v489_v1 = vsel %vm295_vm9, %v474_v62, %v485_v63 }
 0x106   : > { %491 = vst [vmem:[#allocation3 + $0x48] sm:$0xf] %v489_v1 }
 0x10c   : > { %v501_v2 = vld [vmem:[#allocation3 + $0x40] sm:$0xf] }
 0x10d   : > { %v507_v3 = vpack.c.bf16 %v501_v2, %v501_v2  ;;  %v502_v4 = vld [vmem:[#allocation3 + $0x48] sm:$0xf] }
 0x10e   : > { %v508_v5 = vpack.c.bf16 %v502_v4, %v502_v4 }
 0x10f   : > { %v521_v0 = vsel %vm519_vm0, %v507_v3, 0 }
 0x110   : > { %663 = vmatprep.subr.msk.bf16.mxu0 %vm519_vm0, %v508_v5 }
 0x111   : > { %531 = vmatpush1.bf16.msra.mxu0 %v521_v0 }
 0x113   : > { %v513_v51 = vpop.permute.xlu0 %512 }
 0x114   : > { %664 = vmatmul.mubr.msk.bf16.vlgmr.msra.gmra.mrb[0].mxu0 %vm515_vm1, %v492_v6 }
 0x1e7   : > { %v560_v7 = vpop.f32.mrb[0].mxu0 }
 0x1e8   : > { %v561_v8 = vadd.f32 %v560_v7, %v513_v51  ;;  %v562_v9 = vpop.f32.mrb[1].mxu0 }
 0x1e9   : > { %v563_v10 = vadd.f32 %v562_v9, %v513_v51  ;;  %v564_v11 = vpop.f32.mrb[2].mxu0 }
 0x1ea   : > { %567 = vst [vmem:[%s213_s10] sm:$0xff] %v561_v8  ;;  %v565_v12 = vpop.f32.mrb[3].mxu0 }
 0x1eb   : > { %568 = vst [vmem:[%s213_s10 + $0x8] sm:$0xff] %v563_v10 }
 0x1ec   : > { %780 = shalt.err (!%p777_p4)
}
 0x1ed   : > { %s781_s7 = scalar_lea.hbm %s1091_s22, 256  ;;  %s785_s9 = scalar_lea.hbm %s1139_s4, 512 }
 0x1ee   : > { %p782_p5 = scmp.ne.s32.totalorder %s1091_s22, %s781_s7  ;;  %p786_p0 = scmp.lt.u32.totalorder %s1091_s22, %s1139_s4 }
 0x1ef   : > { %p787_p1 = scmp.lt.u32.totalorder %s785_s9, %s781_s7  ;;  %p789_p6 = scmp.lt.u32.totalorder %s781_s7, %s1091_s22 }
 0x1f0   : > { %p783_p8 = pnand %p782_p5, %p1148_p11 }
 0x1f1   : > { %p788_p3 = por %p787_p1, %p786_p0 }
 0x1f2   : > { %p784_p9 = pneg %p783_p8 }
 0x1f3   : > { %p790_p12 = por %p789_p6, %p788_p3 }
 0x1f5   : > { %p791_p13 = pnand %p790_p12, %p784_p9 }
 0x1f7   : > { %794 = shalt.err (!%p791_p13)
}
 0x1f8   : > { %674 = dma.vmem_to_hbm [thread:$0]  (%p1148_p11), %s1093_s11, 256, %s1091_s22, %s570_s19  }
 0x1f9 PF: > { %s596_s8 = sand.u32 1, %s821_s15   ;;  %p1149_p7 = scmp.ne.s32.totalorder %s1144_s28, 0 }
 0x1fa   : > { %p1150_p10 = scmp.ge.s32.totalorder %s833_s18, 2  ;;  %s597_s26 = scalar_lea.sflag [#allocation6], %s596_s8 }
 0x1fc   : > { %p681_p2 = pnand %p1150_p10, %p1149_p7 }
 0x1fe   : > { %816 = dma.done.wait (!%p681_p2), %s597_s26, 256  }
 0x1ff   : > { %818 = vsyncadd (!%p681_p2), %s597_s26, 4294967040  ;;  %p17_p4 = scmp.ge.s32.totalorder %s899_s21, 4   ;;  %s1151_s15 = smov %s825_s16 }
 0x200   : > { %s1152_s16 = smov %s829_s17  ;;  %s1153_s17 = smov %s911_s24 }
 0x201   : > { %s1154_s18 = smov %s899_s21  ;;  %19 = sbr.rel (!%p17_p4) target bundleno = 5 (0x5), region = 81 }
 0x208   :  { %602 = vsyncpa [#allocation5], 1 }
 0x209   :  { %604 = vsyncpa [#allocation5 + $0x1], 1 }
 0x20a   :  { %605 = vsyncpa [#allocation6], 1 }
 0x20b   :  { %607 = vsyncpa [#allocation6 + $0x1], 1 }

</bundles_post_ra>
